<compile_context>
chip_gen: v7x
topology: tpu7x:2x2x1
jax: 0.10.0
libtpu: 0.0.40
codegen_flags: <defaults>
</compile_context>

<pallas_src>
from functools import partial

import jax
import jax.numpy as jnp
import numpy as np
from jax.experimental import pallas as pl
from jax.experimental.pallas import tpu as pltpu


def _nc1_partial_kernel(x_ref, mnorm_ref, labels_ref, s_ref, n_ref, *, dot_in_dtype):
    """Accumulates per-class sum(mask * cos_sim) and sum(mask) for one core.

    x_ref:      (TB, D)       input tile
    mnorm_ref:  (C, D)        pre-normalized means, resident (constant index map)
    labels_ref: (TB, 1) int32 input tile (-1 for padded rows)
    s_ref:      (1, 1, C)     resident output accumulator: sum(mask * sim)
    n_ref:      (1, 1, C)     resident output accumulator: per-class counts
    """
    step = pl.program_id(1)

    @pl.when(step == 0)
    def _init():
        s_ref[...] = jnp.zeros_like(s_ref)
        n_ref[...] = jnp.zeros_like(n_ref)

    x32 = x_ref[...].astype(jnp.float32)                                # (TB, D)
    x_dot = x32 if dot_in_dtype is None else x_ref[...].astype(dot_in_dtype)

    # Cosine-similarity numerator on the MXU, NT form (contract last dims) —
    # no transpose of the means tile.
    sim_raw = jax.lax.dot_general(
        x_dot, mnorm_ref[...],
        dimension_numbers=(((1,), (1,)), ((), ())),
        preferred_element_type=jnp.float32,
    )                                                                    # (TB, C)

    # Deferred row normalization: scale the (TB, C) result instead of the
    # (TB, D) tile.  Exact divide to match the reference numerics.
    x_nrm = jnp.sqrt(jnp.sum(x32 * x32, axis=1, keepdims=True))          # (TB, 1)
    sim = sim_raw * (1.0 / (x_nrm + 1e-10))                              # (TB, C)

    # One-hot mask; (1 - sim) is deferred to the finalize epilogue:
    #   sum_b mask*(1 - sim) = count - sum_b mask*sim
    labels = labels_ref[...]                                             # (TB, 1)
    classes = jax.lax.broadcasted_iota(jnp.int32, sim.shape, 1)          # (TB, C)
    mask = labels == classes                          # padded rows (-1) match nothing

    s_tile = jnp.sum(jnp.where(mask, sim, 0.0), axis=0, keepdims=True)   # (1, C)
    n_tile = jnp.sum(mask.astype(jnp.float32), axis=0, keepdims=True)    # (1, C)
    s_ref[...] += s_tile[None]
    n_ref[...] += n_tile[None]


def _pick_batch_tile(batch_size, feat_dim, itemsize, *, target_bytes=2 << 20,
                     max_tile=8192):
    """Batch tile giving ~target_bytes of x per step (HBM-bound), multiple of 8."""
    tb = target_bytes // max(1, feat_dim * itemsize)
    tb = max(256, min(max_tile, int(tb)))
    tb = (tb // 8) * 8
    if tb >= batch_size:
        return max(8, ((batch_size + 7) // 8) * 8)   # single (padded) tile
    return tb


def nc1_loss_cosine(x, means, labels, *, block_b=None, num_cores=None,
                    dot_in_dtype=None):
    """Returns (loss, means), mirroring NC1Loss_cosine.forward(x, labels)."""
    B, D = x.shape
    C, D2 = means.shape
    assert D == D2

    # Normalize the class means once in plain JAX (exact reference formula);
    # only the normalized (C, D) copy ever enters VMEM (2 pipeline buffers,
    # not 3 like the previous scratch-based version).
    means32 = means.astype(jnp.float32)
    m_nrm = jnp.sqrt(jnp.sum(means32 * means32, axis=1, keepdims=True))
    m_norm = means32 / (m_nrm + 1e-10)
    if dot_in_dtype is not None:
        m_norm = m_norm.astype(dot_in_dtype)

    labels_2d = labels.astype(jnp.int32).reshape(B, 1)

    itemsize = jnp.dtype(x.dtype).itemsize
    tb = _pick_batch_tile(B, D, itemsize) if block_b is None else int(block_b)
    assert tb % 8 == 0, "batch tile must be a multiple of 8"

    num_tiles = pl.cdiv(B, tb)
    if num_cores is None:
        num_cores = 2 if num_tiles >= 2 else 1   # v7x has 2 TCs; harmless on v5e/v6e
    tiles_per_core = pl.cdiv(num_tiles, num_cores)
    b_pad = num_cores * tiles_per_core * tb

    if b_pad != B:
        # Padded rows get label -1 -> match no class -> contribute nothing.
        x = jnp.pad(x, ((0, b_pad - B), (0, 0)))
        labels_2d = jnp.pad(labels_2d, ((0, b_pad - B), (0, 0)), constant_values=-1)

    m_itemsize = jnp.dtype(m_norm.dtype).itemsize
    vmem_bytes = (2 * tb * D * itemsize          # double-buffered x tile
                  + 2 * C * D * m_itemsize       # double-buffered resident means
                  + 2 * tb * 4                   # labels tile
                  + 4 * C * 4)                   # (1, 1, C) partial outputs
    vmem_limit = min(int(vmem_bytes * 1.5) + (2 << 20), 64 << 20)

    kernel = partial(_nc1_partial_kernel, dot_in_dtype=dot_in_dtype)

    s_part, n_part = pl.pallas_call(
        kernel,
        out_shape=(jax.ShapeDtypeStruct((num_cores, 1, C), jnp.float32),
                   jax.ShapeDtypeStruct((num_cores, 1, C), jnp.float32)),
        grid_spec=pltpu.PrefetchScalarGridSpec(
            num_scalar_prefetch=0,
            grid=(num_cores, tiles_per_core),
            in_specs=[
                pl.BlockSpec((tb, D), lambda c, i: (c * tiles_per_core + i, 0)),
                pl.BlockSpec((C, D), lambda c, i: (0, 0)),         # resident means
                pl.BlockSpec((tb, 1), lambda c, i: (c * tiles_per_core + i, 0)),
            ],
            out_specs=[
                pl.BlockSpec((1, 1, C), lambda c, i: (c, 0, 0)),   # resident accumulators
                pl.BlockSpec((1, 1, C), lambda c, i: (c, 0, 0)),
            ],
        ),
        compiler_params=pltpu.CompilerParams(
            dimension_semantics=("parallel", "arbitrary"),  # cores x batch-reduction
            vmem_limit_bytes=vmem_limit,
        ),
    )(x, m_norm, labels_2d)

    # Tiny finalize epilogue in plain JAX:  D_c = count_c - sum(mask*sim)_c.
    s = jnp.sum(s_part[:, 0, :], axis=0)                  # (C,)
    n = jnp.sum(n_part[:, 0, :], axis=0)                  # (C,)
    ratio = jnp.clip((n - s) / (n + 1e-10), 1e-12, 1e12)
    loss = jnp.sum(ratio) / float(C)
    return loss, means


def _reference(x, means, labels, num_classes):
    """Pure-JAX mirror of the PyTorch forward (for validation)."""
    x = x.astype(jnp.float32)
    means = means.astype(jnp.float32)
    x_norm = x / (jnp.linalg.norm(x, axis=1, keepdims=True) + 1e-10)
    m_norm = means / (jnp.linalg.norm(means, axis=1, keepdims=True) + 1e-10)
    dist = 1.0 - x_norm @ m_norm.T
    mask = (labels[:, None] == jnp.arange(num_classes)[None, :]).astype(jnp.float32)
    d = jnp.sum(dist * mask, axis=0)
    n = jnp.sum(mask, axis=0) + 1e-10
    return jnp.sum(jnp.clip(d / n, 1e-12, 1e12)) / num_classes


if __name__ == "__main__":
    key = jax.random.PRNGKey(0)

    # Small deterministic configuration consistent with the module defaults.
    num_classes = 10
    feat_dim = 128
    batch_size = 60     # ragged on purpose: exercises the pad-to-grid path

    k_m, k_x, k_lab = jax.random.split(key, 3)
    means = jax.random.normal(k_m, (num_classes, feat_dim), dtype=jnp.float32)
    x = jax.random.normal(k_x, (batch_size, feat_dim), dtype=jnp.float32)
    labels = jax.random.randint(k_lab, (batch_size,), 0, num_classes, dtype=jnp.int32)

    # Small tile + 2-core split so the test exercises the tiled, partial-sum path.
    loss, means_out = nc1_loss_cosine(x, means, labels, block_b=16, num_cores=2)
    jax.block_until_ready(loss)
    jax.block_until_ready(means_out)

    ref = _reference(x, means, labels, num_classes)
    np.testing.assert_allclose(np.asarray(loss), np.asarray(ref), rtol=1e-2, atol=1e-5)

    print("KERNEL_OK")
</pallas_src>

<mosaic_0001>
module attributes {stable_mosaic.version = 11 : i64} {
  func.func @_nc1_partial_kernel(%arg0: i32, %arg1: i32, %arg2: memref<16x128xf32, #tpu.memory_space<vmem>>, %arg3: memref<10x128xf32, #tpu.memory_space<vmem>>, %arg4: memref<16x1xi32, #tpu.memory_space<vmem>>, %arg5: memref<1x1x10xf32, #tpu.memory_space<vmem>>, %arg6: memref<1x1x10xf32, #tpu.memory_space<vmem>>) attributes {dimension_semantics = [#tpu.dimension_semantics<parallel>, #tpu.dimension_semantics<arbitrary>], iteration_bounds = array<i64: 2, 2>, scalar_prefetch = 0 : i64, scratch_operands = 0 : i64, tpu.core_type = #tpu.core_type<tc>, window_params = [{transform_indices = @transform_0, window_bounds = array<i64: 16, 128>}, {pipeline_mode = #tpu.pipeline_mode<synchronous>, transform_indices = @transform_1, window_bounds = array<i64: 10, 128>}, {transform_indices = @transform_2, window_bounds = array<i64: 16, 1>}, {transform_indices = @transform_3, window_bounds = array<i64: 1, 1, 10>}, {transform_indices = @transform_4, window_bounds = array<i64: 1, 1, 10>}]} {
    %c0_i32 = arith.constant 0 : i32
    %0 = arith.cmpi eq, %arg1, %c0_i32 : i32
    %1 = arith.extui %0 : i1 to i32
    %c0_i32_0 = arith.constant 0 : i32
    %2 = arith.cmpi ne, %1, %c0_i32_0 : i32
    scf.if %2 {
      %cst_24 = arith.constant 0.000000e+00 : f32
      %36 = vector.broadcast %cst_24 : f32 to vector<1x1x10xf32>
      %c0_25 = arith.constant 0 : index
      %c0_26 = arith.constant 0 : index
      %c0_27 = arith.constant 0 : index
      %37 = vector.load %arg5[%c0_25, %c0_26, %c0_27] : memref<1x1x10xf32, #tpu.memory_space<vmem>>, vector<1x1x10xf32>
      tpu.vector_store %arg5[%c0_25, %c0_26, %c0_27], %36 {strides = array<i32>} : memref<1x1x10xf32, #tpu.memory_space<vmem>>, vector<1x1x10xf32>,
      %cst_28 = arith.constant 0.000000e+00 : f32
      %38 = vector.broadcast %cst_28 : f32 to vector<1x1x10xf32>
      %c0_29 = arith.constant 0 : index
      %c0_30 = arith.constant 0 : index
      %c0_31 = arith.constant 0 : index
      %39 = vector.load %arg6[%c0_29, %c0_30, %c0_31] : memref<1x1x10xf32, #tpu.memory_space<vmem>>, vector<1x1x10xf32>
      tpu.vector_store %arg6[%c0_29, %c0_30, %c0_31], %38 {strides = array<i32>} : memref<1x1x10xf32, #tpu.memory_space<vmem>>, vector<1x1x10xf32>,
    } else {
    }
    %c0 = arith.constant 0 : index
    %c0_1 = arith.constant 0 : index
    %3 = vector.load %arg2[%c0, %c0_1] : memref<16x128xf32, #tpu.memory_space<vmem>>, vector<16x128xf32>
    %c0_2 = arith.constant 0 : index
    %c0_3 = arith.constant 0 : index
    %4 = vector.load %arg3[%c0_2, %c0_3] : memref<10x128xf32, #tpu.memory_space<vmem>>, vector<10x128xf32>
    %cst = arith.constant dense<0.000000e+00> : vector<16x10xf32>
    %5 = tpu.matmul %3, %4, %cst {dimension_numbers = #tpu.dot_dimension_numbers<[1], [1], [0], [0], [0, 0, 1, 0], [], []>} : vector<16x128xf32>, vector<10x128xf32>, vector<16x10xf32> -> vector<16x10xf32>
    %6 = arith.mulf %3, %3 : vector<16x128xf32>
    %cst_4 = arith.constant dense<0.000000e+00> : vector<16xf32>
    %7 = vector.multi_reduction <add>, %6, %cst_4 [1] : vector<16x128xf32> to vector<16xf32>
    %8 = vector.shape_cast %7 : vector<16xf32> to vector<16x1xf32>
    %9 = math.sqrt %8 : vector<16x1xf32>
    %cst_5 = arith.constant 1.000000e-10 : f32
    %10 = vector.broadcast %cst_5 : f32 to vector<16x1xf32>
    %11 = arith.addf %9, %10 : vector<16x1xf32>
    %cst_6 = arith.constant 1.000000e+00 : f32
    %12 = vector.broadcast %cst_6 : f32 to vector<16x1xf32>
    %13 = arith.divf %12, %11 : vector<16x1xf32>
    %14 = vector.broadcast %13 : vector<16x1xf32> to vector<16x10xf32>
    %15 = arith.mulf %5, %14 : vector<16x10xf32>
    %c0_7 = arith.constant 0 : index
    %c0_8 = arith.constant 0 : index
    %16 = vector.load %arg4[%c0_7, %c0_8] : memref<16x1xi32, #tpu.memory_space<vmem>>, vector<16x1xi32>
    %17 = tpu.iota {dimensions = array<i32: 1>} : vector<16x10xi32>
    %18 = vector.broadcast %16 : vector<16x1xi32> to vector<16x10xi32>
    %19 = arith.cmpi eq, %18, %17 : vector<16x10xi32>
    %cst_9 = arith.constant 0.000000e+00 : f32
    %20 = vector.broadcast %cst_9 : f32 to vector<16x10xf32>
    %21 = arith.select %19, %15, %20 : vector<16x10xi1>, vector<16x10xf32>
    %cst_10 = arith.constant dense<0.000000e+00> : vector<10xf32>
    %22 = vector.multi_reduction <add>, %21, %cst_10 [0] : vector<16x10xf32> to vector<10xf32>
    %23 = vector.shape_cast %22 : vector<10xf32> to vector<1x10xf32>
    %24 = arith.extui %19 : vector<16x10xi1> to vector<16x10xi32>
    %25 = arith.sitofp %24 : vector<16x10xi32> to vector<16x10xf32>
    %cst_11 = arith.constant dense<0.000000e+00> : vector<10xf32>
    %26 = vector.multi_reduction <add>, %25, %cst_11 [0] : vector<16x10xf32> to vector<10xf32>
    %27 = vector.shape_cast %26 : vector<10xf32> to vector<1x10xf32>
    %c0_12 = arith.constant 0 : index
    %c0_13 = arith.constant 0 : index
    %c0_14 = arith.constant 0 : index
    %28 = vector.load %arg5[%c0_12, %c0_13, %c0_14] : memref<1x1x10xf32, #tpu.memory_space<vmem>>, vector<1x1x10xf32>
    %29 = vector.shape_cast %23 : vector<1x10xf32> to vector<1x1x10xf32>
    %30 = arith.addf %28, %29 : vector<1x1x10xf32>
    %c0_15 = arith.constant 0 : index
    %c0_16 = arith.constant 0 : index
    %c0_17 = arith.constant 0 : index
    %31 = vector.load %arg5[%c0_15, %c0_16, %c0_17] : memref<1x1x10xf32, #tpu.memory_space<vmem>>, vector<1x1x10xf32>
    tpu.vector_store %arg5[%c0_15, %c0_16, %c0_17], %30 {strides = array<i32>} : memref<1x1x10xf32, #tpu.memory_space<vmem>>, vector<1x1x10xf32>,
    %c0_18 = arith.constant 0 : index
    %c0_19 = arith.constant 0 : index
    %c0_20 = arith.constant 0 : index
    %32 = vector.load %arg6[%c0_18, %c0_19, %c0_20] : memref<1x1x10xf32, #tpu.memory_space<vmem>>, vector<1x1x10xf32>
    %33 = vector.shape_cast %27 : vector<1x10xf32> to vector<1x1x10xf32>
    %34 = arith.addf %32, %33 : vector<1x1x10xf32>
    %c0_21 = arith.constant 0 : index
    %c0_22 = arith.constant 0 : index
    %c0_23 = arith.constant 0 : index
    %35 = vector.load %arg6[%c0_21, %c0_22, %c0_23] : memref<1x1x10xf32, #tpu.memory_space<vmem>>, vector<1x1x10xf32>
    tpu.vector_store %arg6[%c0_21, %c0_22, %c0_23], %34 {strides = array<i32>} : memref<1x1x10xf32, #tpu.memory_space<vmem>>, vector<1x1x10xf32>,
    return
  }
  func.func @transform_0(%arg0: i32, %arg1: i32) -> (i32, i32) {
    %c2_i32 = arith.constant 2 : i32
    %0 = arith.muli %arg0, %c2_i32 : i32
    %1 = arith.addi %0, %arg1 : i32
    %c0_i32 = arith.constant 0 : i32
    %c0_i32_0 = arith.constant 0 : i32
    return %1, %c0_i32 : i32, i32
  }
  func.func @transform_1(%arg0: i32, %arg1: i32) -> (i32, i32) {
    %c0_i32 = arith.constant 0 : i32
    %c0_i32_0 = arith.constant 0 : i32
    %c0_i32_1 = arith.constant 0 : i32
    return %c0_i32, %c0_i32_0 : i32, i32
  }
  func.func @transform_2(%arg0: i32, %arg1: i32) -> (i32, i32) {
    %c2_i32 = arith.constant 2 : i32
    %0 = arith.muli %arg0, %c2_i32 : i32
    %1 = arith.addi %0, %arg1 : i32
    %c0_i32 = arith.constant 0 : i32
    %c0_i32_0 = arith.constant 0 : i32
    return %1, %c0_i32 : i32, i32
  }
  func.func @transform_3(%arg0: i32, %arg1: i32) -> (i32, i32, i32) {
    %c0_i32 = arith.constant 0 : i32
    %c0_i32_0 = arith.constant 0 : i32
    %c0_i32_1 = arith.constant 0 : i32
    return %arg0, %c0_i32, %c0_i32_0 : i32, i32, i32
  }
  func.func @transform_4(%arg0: i32, %arg1: i32) -> (i32, i32, i32) {
    %c0_i32 = arith.constant 0 : i32
    %c0_i32_0 = arith.constant 0 : i32
    %c0_i32_1 = arith.constant 0 : i32
    return %arg0, %c0_i32, %c0_i32_0 : i32, i32, i32
  }
}

</mosaic_0001>

<bundles_post_ra>
// kernel: tpu_custom_call.1
= control target key start
LH: loop header
LB: loop body
LE: loop exit
PB: predicated region body
PF: predicated region fallthrough
CT: control target
= control target key end

     0   :  { %10 = vsyncpa [#allocation3], 0  ;;  %s1176_s0 = inlined_call_operand.vmem [shape: f32[64,128], index: 0, kind: input, shape index: {}]   ;;  %s1177_s1 = inlined_call_operand.hbm [shape: f32[10,128], index: 1, kind: input, shape index: {}]   ;;  %s1178_s2 = inlined_call_operand.vmem [shape: s32[64,1], index: 2, kind: input, shape index: {}]   ;;  %s1179_s3 = inlined_call_operand.hbm [shape: f32[2,1,10], index: 3, kind: output, shape index: {0}]   ;;  %s1180_s4 = inlined_call_operand.hbm [shape: f32[2,1,10], index: 4, kind: output, shape index: {1}]  }
   0x1   :  { %11 = vsyncpa [#allocation4], 0 }
   0x2   :  { %13 = vsyncpa [#allocation4 + $0x1], 0 }
   0x3   :  { %14 = vsyncpa [#allocation7], 0 }
   0x4   :  { %16 = vsyncpa [#allocation7 + $0x1], 0  ;;  %s924_s15 = smov 0   ;;  %s926_s16 = smov 0  }
   0x5   :  { %s928_s17 = smov 0   ;;  %s930_s18 = smov 0  }
   0x6   :  { %s932_s19 = smov 0   ;;  %s934_s20 = smov 0  }
   0x7   :  { %s936_s21 = smov 0   ;;  %s938_s22 = smov 0  }
   0x8 LB: > { %s590_s23 = sadd.s32 4294967295, %s889_s22   ;;  %s591_s24 = sadd.s32 4294967294, %s889_s22   ;;  %s889_s22 = sphi %s938_s22, %s22_s22   ;;  %s885_s21 = sphi %s936_s21, %s1200_s21   ;;  %s881_s20 = sphi %s934_s20, %s1199_s20   ;;  %s877_s19 = sphi %s932_s19, %s1198_s19   ;;  %s873_s18 = sphi %s930_s18, %s1197_s18   ;;  %s869_s17 = sphi %s928_s17, %s1196_s17   ;;  %s865_s16 = sphi %s926_s16, %s1195_s16   ;;  %s861_s15 = sphi %s924_s15, %s1194_s15  }
   0x9   : > { %s31_s25 = sadd.s32 1, %s881_s20  ;;  %s34_s26 = sadd.s32 1, %s885_s21 }
   0xa   : > { %p32_p0 = scmp.ge.s32.totalorder %s31_s25, 2  ;;  %s122_s27 = sadd.s32 1, %s869_s17 }
   0xb   : > { %p132_p1 = scmp.ne.s32.totalorder %s869_s17, %s865_s16  ;;  %p133_p2 = scmp.eq.s32.totalorder %s590_s23, 3 }
   0xc   : > { %s1202_s25 = smov (%p32_p0, %s31_s25), 0  ;;  %s1204_s26 = smov (!%p32_p0, %s34_s26), %s885_s21 }
   0xd   : > { %p974_p3 = por %p133_p2, %p132_p1  ;;  %p138_p4 = scmp.ne.s32.totalorder %s865_s16, %s861_s15 }
   0xe   : > { %p36_p5 = scmp.ge.s32.totalorder %s1204_s26, 2  ;;  %p139_p6 = scmp.eq.s32.totalorder %s591_s24, 3 }
   0xf   : > { %s1185_s28 = scalar_select %p974_p3, 1, 0 }
  0x10   : > { %p596_p7 = scmp.ge.s32.totalorder %s889_s22, 1  ;;  %p172_p8 = scmp.lt.s32.totalorder %s889_s22, 5 }
  0x11   : > { %s1206_s26 = smov (%p36_p5, %s1204_s26), 0  ;;  %p984_p9 = por %p139_p6, %p138_p4 }
  0x12   : > { %p988_p10 = pnand %p596_p7, %p172_p8  ;;  %s119_s5 = ssub.s32 %s885_s21, %s1206_s26 }
  0x13   : > { %s1186_s29 = scalar_select %p984_p9, 1, 0 }
  0x14   : > { %s1187_s30 = scalar_select %p988_p10, 1, 0 }
  0x15   : > { %p120_p11 = scmp.eq.s32.totalorder %s119_s5, 0  ;;  %p637_p12 = pneg %p988_p10 }
  0x16   : > { %p996_p13 = scmp.eq.s32.totalorder %s590_s23, 0  ;;  %s891_s8 = smov [#allocation2]  }
  0x17   : > { %s1001_s7 = scalar_select %p120_p11, %s869_s17, %s122_s27  }
  0x18   : > { %s1188_s6 = scalar_select %p996_p13, 1, 0 }
  0x19   : > { %s184_s9 = sshll.u32 %s891_s8, 4  ;;  %p1005_p0 = pnand %p996_p13, %p637_p12  ;;  %s185_s9 = int_to_ptr.vmem [resolvable:$true] %s184_s9 }
  0x1a   : > { %s731_s13 = scalar_lea.hbm %s1177_s1, 256 }
  0x1b   : > { %p732_p1 = scmp.ne.s32.totalorder %s1177_s1, %s731_s13  ;;  %p733_p2 = pneg %p1005_p0 }
  0x1c   : > { %p738_p6 = scmp.lt.u32.totalorder %s731_s13, %s1177_s1 }
  0x1d   : > { %p734_p4 = pnand %p733_p2, %p732_p1 }
  0x1f   : > { %p735_p5 = pneg %p734_p4 }
  0x21   : > { %p740_p7 = pnand %p738_p6, %p735_p5 }
  0x23   : > { %743 = shalt.err (!%p740_p7)
}
  0x24   : > { %s744_s5 = scalar_lea.vmem %s185_s9, 256  ;;  %p752_p9 = scmp.lt.s32.totalorder %s185_s9, %s185_s9 }
  0x25   : > { %p745_p8 = scmp.ne.s32.totalorder %s185_s9, %s744_s5  ;;  %p753_p3 = scmp.lt.s32.totalorder %s744_s5, %s744_s5 }
  0x27   : > { %p747_p11 = pnand %p745_p8, %p733_p2  ;;  %p754_p13 = por %p753_p3, %p752_p9 }
  0x29   : > { %p748_p12 = pneg %p747_p11 }
  0x2b   : > { %p755_p10 = pnand %p754_p13, %p748_p12 }
  0x2d   : > { %758 = shalt.err (!%p755_p10)
}
  0x2e   : > { %s892_s8 = smov 128   ;;  %s893_s11 = smov 8  }
  0x2f   : > { %640 = dma.hbm_to_vmem [thread:$0]  (!%p1005_p0), %s1177_s1, 256, %s185_s9, [#allocation3], %s892_s8, %s892_s8, %s893_s11  }
  0x30   : > { %p1190_p1 = scmp.ne.s32.totalorder %s1187_s30, 0 }
  0x31   : > { %p1191_p4 = scmp.ne.s32.totalorder (!%p1190_p1), %s1188_s6, 0 }
  0x32   : > { %226 = sbr.rel (%p1190_p1) target bundleno = 328 (0x148), region = 32 }
  0x39   : > { %848 = dma.done.wait (%p1191_p4), [#allocation3], 256  }
  0x3a   : > { %850 = vsyncadd (%p1191_p4), [#allocation3], 4294967040  ;;  %s1032_s13 = sand.u32 1, %s865_s16   ;;  %s601_s10 = sshll.u32 %s877_s19, 1 }
  0x3b   : > { %s265_s23 = sadd.s32 %s873_s18, %s601_s10  ;;  %s1043_s12 = scalar_lea.vmem [#allocation5], %s1032_s13 }
  0x3c   : > { %s602_s24 = sshll.u32 %s265_s23, 1  ;;  %s1046_s14 = scalar_lea.vmem [#allocation6], %s1032_s13 }
  0x3d   : > { %p267_p3 = scmp.lt.s32.totalorder %s602_s24, 7  ;;  %p607_p9 = scmp.ne.s32.totalorder %s873_s18, 0 }
  0x3e   : > { %vm288_vm0 = vcmask (!%p607_p9), 73728   ;;  %v894_v0 = vmov (!%p607_p9), 0.0  }
  0x3f   : > { %s1208_s24 = smov (!%p267_p3, %s602_s24), 7  ;;  %287 = sbr.rel (%p607_p9) target bundleno = 70 (0x46), region = 40 }
  0x40   : > { %s603_s30 = sshll.u32 %s1208_s24, 3  ;;  %289 = vst.msk [vmem:[%s1043_s12] sm:$0x1] (!%p607_p9), %vm288_vm0, %v894_v0  ;;  %290 = vst.msk [vmem:[%s1046_s14] sm:$0x1] (!%p607_p9), %vm288_vm0, %v894_v0 }
  0x41   : > { %s270_s5 = scalar_lea.vmem %s1176_s0, %s603_s30  ;;  %s280_s11 = scalar_lea.vmem %s1178_s2, %s603_s30 }
  0x46 PF: > { %v293_v1 = vld [vmem:[#allocation2] sm:$0xff]  ;;  %v294_v2 = vld [vmem:[#allocation2 + $0x8] sm:$0x3]  ;;  %v895_v6 = vmov 0   ;;  %v400_v11 = vlaneseq  ;;  %vm412_vm2 = vcmask 80896   ;;  %v896_v14 = vmov 0.0  }
  0x47   : > { %v291_v3 = vld [vmem:[%s270_s5] sm:$0xff]  ;;  %v625_v4 = vpack.c.bf16 %v294_v2, %v293_v1  ;;  %721 = vset.pattern.permute.xlu1 %v895_v6  ;;  %v292_v8 = vld [vmem:[%s270_s5 + $0x8] sm:$0xff]  ;;  %722 = vset.pattern.permute.xlu0 %v895_v6  ;;  %s610_s18 = sshll.u32 %s877_s19, 4  ;;  %s472_s10 = sshll.u32 %s1046_s14, 4  ;;  %vm437_vm4 = vcmask 73728   ;;  %s1079_s10 = int_to_ptr.vmem [resolvable:$true] %s472_s10 }
  0x48   : > { %622 = vmatprep.mubr.f32.mxu0 %v291_v3  ;;  %v370_v5 = vmul.f32 %v291_v3, %v291_v3  ;;  %v398_v7 = vld [vmem:[%s280_s11] sm:$0xff]  ;;  %v371_v9 = vmul.f32 %v292_v8, %v292_v8  ;;  %v399_v10 = vld [vmem:[%s280_s11 + $0x8] sm:$0xff]  ;;  %v1051_v12 = vand.u32 127, %v400_v11  ;;  %s1077_s30 = scalar_lea.hbm %s1180_s4, %s610_s18  ;;  %s447_s9 = scalar_lea.sflag [#allocation7], %s1032_s13 }
  0x49   : > { %403 = vperm.xlu1 %721, %v398_v7   ;;  %626 = vmatprep.subr.bf16.mxu0 %v625_v4  ;;  %v439_v26 = vld [vmem:[%s1046_s14] sm:$0x1]  ;;  %s759_s27 = scalar_lea.vmem %s1079_s10, 16  ;;  %p1192_p13 = scmp.ne.s32.totalorder %s1185_s28, 0 }
  0x4a   : > { %372 = vadd.xlane.f32.xlu0 %v370_v5  ;;  %628 = vmatpush3.bf16.xpose.msra.mxu0 %v625_v4  ;;  %p760_p10 = scmp.ne.s32.totalorder %s1079_s10, %s759_s27  ;;  %s897_s5 = smov [#allocation6]  }
  0x4b   : > { %s763_s8 = sshll.u32 %s897_s5, 4  ;;  %s764_s8 = int_to_ptr.vmem [resolvable:$false] %s763_s8 }
  0x4c   : > { %p761_p0 = pnand %p760_p10, %p1192_p13  ;;  %s765_s6 = scalar_lea.vmem %s764_s8, 32 }
  0x4d   : > { %406 = vperm.xlu1 %721, %v399_v10   ;;  %p766_p5 = scmp.lt.s32.totalorder %s1079_s10, %s764_s8  ;;  %p767_p6 = scmp.lt.s32.totalorder %s765_s6, %s759_s27 }
  0x4e   : > { %374 = vadd.xlane.f32.xlu0 %v371_v9  ;;  %p762_p2 = pneg %p761_p0 }
  0x4f   : > { %p768_p7 = por %p767_p6, %p766_p5 }
  0x51   : > { %623 = vmatmul.mubr.f32.vlgmr.msra.gmra.mrb[0].mxu0 %v292_v8  ;;  %p769_p8 = pnand %p768_p7, %p762_p2 }
  0xc8   : > { %v1053_v13 = vpop.permute.xlu1 %403 }
  0xc9   : > { %vm408_vm1 = vcmp.eq.s32.totalorder %v1053_v13, %v1051_v12 }
  0xca   : > { %v608_v15 = vsel %vm408_vm1, 1.0, %v896_v14 }
  0xcb   : > { %v426_v17 = vsel %vm412_vm2, %v608_v15, 0.0 }
  0xcc   : > { %v1060_v16 = vpop.permute.xlu1 %406 }
  0xcd   : > { %vm409_vm3 = vcmp.eq.s32.totalorder %v1060_v16, %v1051_v12 }
  0xce   : > { %v609_v18 = vsel %vm409_vm3, 1.0, %v896_v14 }
  0xcf   : > { %v427_v19 = vsel %vm412_vm2, %v609_v18, 0.0 }
  0xd0   : > { %v428_v20 = vadd.f32 %v427_v19, %v426_v17 }
  0xd2   : > { %v429_v21 = vrot.slane %v428_v20, 4 }
  0xd4   : > { %v430_v22 = vadd.f32 %v429_v21, %v428_v20 }
  0xd6   : > { %v431_v23 = vrot.slane %v430_v22, 2 }
  0xd8   : > { %v432_v24 = vadd.f32 %v431_v23, %v430_v22 }
  0xda   : > { %v433_v25 = vrot.slane %v432_v24, 1 }
  0xdc   : > { %v434_v27 = vadd.f32 %v433_v25, %v432_v24 }
  0xde   : > { %v440_v28 = vadd.f32 %v439_v26, %v434_v27 }
  0xe0   : > { %441 = vst.msk [vmem:[%s1046_s14] sm:$0x1] %vm437_vm4, %v440_v28 }
  0xe1   : > { %772 = shalt.err (!%p769_p8)
}
  0xe2   : > { %s773_s11 = scalar_lea.hbm %s1077_s30, 16  ;;  %s777_s24 = scalar_lea.hbm %s1180_s4, 32 }
  0xe3   : > { %p774_p11 = scmp.ne.s32.totalorder %s1077_s30, %s773_s11  ;;  %p778_p4 = scmp.lt.u32.totalorder %s1077_s30, %s1180_s4 }
  0xe4   : > { %p779_p3 = scmp.lt.u32.totalorder %s777_s24, %s773_s11  ;;  %p781_p10 = scmp.lt.u32.totalorder %s773_s11, %s1077_s30 }
  0xe5   : > { %p775_p12 = pnand %p774_p11, %p1192_p13 }
  0xe6   : > { %p780_p9 = por %p779_p3, %p778_p4 }
  0xe7   : > { %p776_p1 = pneg %p775_p12 }
  0xe8   : > { %p782_p0 = por %p781_p10, %p780_p9 }
  0xea   : > { %p783_p2 = pnand %p782_p0, %p776_p1 }
  0xec   : > { %786 = shalt.err (!%p783_p2)
}
  0xed   : > { %634 = dma.vmem_to_hbm [thread:$0]  (%p1192_p13), %s1079_s10, 16, %s1077_s30, %s447_s9   ;;  %v373_v29 = vpop.xlane.xlu0 %372  ;;  %v435_v59 = vld [vmem:[%s1043_s12] sm:$0x1] }
  0xee   : > { %vm378_vm6 = vcmp.eq.f32.partialorder %v373_v29, inf  ;;  %v381_v36 = vand.u32 2147483648, %v373_v29  ;;  %vm380_vm8 = vcmp.eq.f32.partialorder %v373_v29, 0.0  ;;  %s459_s10 = sshll.u32 %s1043_s12, 4  ;;  %s1120_s27 = scalar_lea.hbm %s1179_s3, %s610_s18  ;;  %s1122_s10 = int_to_ptr.vmem [resolvable:$true] %s459_s10 }
  0xef   : > { %s443_s6 = scalar_lea.sflag [#allocation4], %s1032_s13  ;;  %s787_s11 = scalar_lea.vmem %s1122_s10, 16 }
  0xf0   : > { %p788_p5 = scmp.ne.s32.totalorder %s1122_s10, %s787_s11  ;;  %s898_s14 = smov [#allocation5]  }
  0xf1   : > { %v375_v30 = vpop.xlane.xlu0 %374  ;;  %s791_s19 = sshll.u32 %s898_s14, 4  ;;  %s792_s19 = int_to_ptr.vmem [resolvable:$false] %s791_s19 }
  0xf2   : > { %723 = vrsqrt.f32 %v375_v30  ;;  %vm385_vm5 = vcmp.eq.f32.partialorder %v375_v30, inf  ;;  %v388_v35 = vand.u32 2147483648, %v375_v30  ;;  %vm387_vm7 = vcmp.eq.f32.partialorder %v375_v30, 0.0  ;;  %p789_p6 = pnand %p788_p5, %p1192_p13  ;;  %s793_s23 = scalar_lea.vmem %s792_s19, 32 }
  0xf3   : > { %725 = vrsqrt.f32 %v373_v29  ;;  %p794_p8 = scmp.lt.s32.totalorder %s1122_s10, %s792_s19  ;;  %p795_p11 = scmp.lt.s32.totalorder %s793_s23, %s787_s11 }
  0xf4   : > { %p790_p7 = pneg %p789_p6 }
  0xf5   : > { %p796_p12 = por %p795_p11, %p794_p8 }
  0xf7   : > { %p797_p1 = pnand %p796_p12, %p790_p7 }
  0xfc   : > { %v724_v31 = vpop.eup %723 }
  0xfd   : > { %v726_v32 = vpop.eup %725  ;;  %v384_v33 = vmul.f32 %v724_v31, %v375_v30 }
  0xfe   : > { %v377_v34 = vmul.f32 %v726_v32, %v373_v29 }
  0xff   : > { %v386_v37 = vsel %vm385_vm5, %v375_v30, %v384_v33 }
 0x100   : > { %v379_v38 = vsel %vm378_vm6, %v373_v29, %v377_v34  ;;  %v389_v39 = vsel %vm387_vm7, %v388_v35, %v386_v37 }
 0x101   : > { %v382_v40 = vsel %vm380_vm8, %v381_v36, %v379_v38  ;;  %v391_v41 = vadd.f32 1e-10, %v389_v39 }
 0x102   : > { %v390_v42 = vadd.f32 1e-10, %v382_v40 }
 0x103   : > { %727 = vrcp.f32 %v391_v41 }
 0x104   : > { %729 = vrcp.f32 %v390_v42 }
 0x10d   : > { %v728_v43 = vpop.eup %727 }
 0x10e   : > { %v730_v45 = vpop.eup %729 }
 0x124   : > { %v624_v44 = vpop.f32.mrb[0].mxu0 }
 0x125   : > { %v397_v46 = vmul.f32 %v728_v43, %v624_v44  ;;  %v361_v47 = vpop.f32.mrb[1].mxu0 }
 0x126   : > { %v396_v48 = vmul.f32 %v730_v45, %v361_v47 }
 0x127   : > { %v411_v49 = vsel %vm409_vm3, %v397_v46, 0.0 }
 0x128   : > { %v414_v50 = vsel %vm412_vm2, %v411_v49, 0.0  ;;  %v410_v51 = vsel %vm408_vm1, %v396_v48, 0.0 }
 0x129   : > { %v413_v52 = vsel %vm412_vm2, %v410_v51, 0.0 }
 0x12a   : > { %v415_v53 = vadd.f32 %v414_v50, %v413_v52 }
 0x12c   : > { %v416_v54 = vrot.slane %v415_v53, 4 }
 0x12e   : > { %v417_v55 = vadd.f32 %v416_v54, %v415_v53 }
 0x130   : > { %v418_v56 = vrot.slane %v417_v55, 2 }
 0x132   : > { %v419_v57 = vadd.f32 %v418_v56, %v417_v55 }
 0x134   : > { %v420_v58 = vrot.slane %v419_v57, 1 }
 0x136   : > { %v421_v60 = vadd.f32 %v420_v58, %v419_v57 }
 0x138   : > { %v436_v61 = vadd.f32 %v435_v59, %v421_v60 }
 0x13a   : > { %438 = vst.msk [vmem:[%s1043_s12] sm:$0x1] %vm437_vm4, %v436_v61 }
 0x13b   : > { %800 = shalt.err (!%p797_p1)
}
 0x13c   : > { %s801_s13 = scalar_lea.hbm %s1120_s27, 16  ;;  %s805_s24 = scalar_lea.hbm %s1179_s3, 32 }
 0x13d   : > { %p802_p4 = scmp.ne.s32.totalorder %s1120_s27, %s801_s13  ;;  %p806_p10 = scmp.lt.u32.totalorder %s1120_s27, %s1179_s3 }
 0x13e   : > { %p807_p0 = scmp.lt.u32.totalorder %s805_s24, %s801_s13  ;;  %p809_p5 = scmp.lt.u32.totalorder %s801_s13, %s1120_s27 }
 0x13f   : > { %p803_p3 = pnand %p802_p4, %p1192_p13 }
 0x140   : > { %p808_p2 = por %p807_p0, %p806_p10 }
 0x141   : > { %p804_p9 = pneg %p803_p3 }
 0x142   : > { %p810_p6 = por %p809_p5, %p808_p2 }
 0x144   : > { %p811_p7 = pnand %p810_p6, %p804_p9 }
 0x146   : > { %814 = shalt.err (!%p811_p7)
}
 0x147   : > { %633 = dma.vmem_to_hbm [thread:$0]  (%p1192_p13), %s1122_s10, 16, %s1120_s27, %s443_s6  }
 0x148 PF: > { %p650_p8 = scmp.ge.s32.totalorder %s889_s22, 2  ;;  %s484_s30 = sand.u32 1, %s861_s15  }
 0x149   : > { %p1193_p11 = scmp.ne.s32.totalorder %s1186_s29, 0  ;;  %s485_s9 = scalar_lea.sflag [#allocation4], %s484_s30 }
 0x14b   : > { %p642_p12 = pnand %p650_p8, %p1193_p11 }
 0x14d   : > { %852 = dma.done.wait (!%p642_p12), %s485_s9, 16  }
 0x14e   : > { %854 = vsyncadd (!%p642_p12), %s485_s9, 4294967280  ;;  %s493_s11 = scalar_lea.sflag [#allocation7], %s484_s30 }
 0x14f   : > { %856 = dma.done.wait (!%p642_p12), %s493_s11, 16  }
 0x150   : > { %858 = vsyncadd (!%p642_p12), %s493_s11, 4294967280  ;;  %s22_s22 = sadd.s32 1, %s889_s22   ;;  %s1194_s15 = smov %s865_s16 }
 0x151   : > { %p19_p1 = scmp.ge.s32.totalorder %s22_s22, 6   ;;  %s1195_s16 = smov %s869_s17 }
 0x152   : > { %s1196_s17 = smov %s1001_s7  ;;  %s1197_s18 = smov %s881_s20 }
 0x153   : > { %s1198_s19 = smov %s885_s21  ;;  %s1199_s20 = smov %s1202_s25 }
 0x154   : > { %s1200_s21 = smov %s1206_s26  ;;  %21 = sbr.rel (!%p19_p1) target bundleno = 8 (0x8), region = 96 }
 0x15b   :  { %497 = vsyncpa [#allocation3], 1 }
 0x15c   :  { %499 = vsyncpa [#allocation3 + $0x1], 1 }
 0x15d   :  { %500 = vsyncpa [#allocation4], 1 }
 0x15e   :  { %502 = vsyncpa [#allocation4 + $0x1], 1 }
 0x15f   :  { %503 = vsyncpa [#allocation7], 1 }
 0x160   :  { %505 = vsyncpa [#allocation7 + $0x1], 1 }

</bundles_post_ra>
